<compile_context>
chip_gen: v6e
topology: v6e:2x2x1
jax: 0.10.0
libtpu: 0.0.40
codegen_flags: <defaults>
</compile_context>

<pallas_src>
import jax
import jax.numpy as jnp
from jax.experimental import pallas as pl
from jax.experimental.pallas import tpu as pltpu


def _round_up(x, m):
    return ((x + m - 1) // m) * m


# ---------------------------------------------------------------------------
# Kernel: all activations carry batch on the lane axis.
# ---------------------------------------------------------------------------
def _value_net_kernel(state_ref, w1t_ref, w23t_ref, bcol_ref, w4row_ref, b4_ref,
                      out_ref):
    # state_ref : (Sd, TB)    one batch tile, batch on lanes (pipelined)
    # w1t_ref   : (Hp, Sd)    layer-1 weight, transposed (VMEM resident)
    # w23t_ref  : (2, Hp, Hp) layers 2 & 3 weights, transposed (resident)
    # bcol_ref  : (Hp, 3)     bias columns b1 | b2 | b3 (resident)
    # w4row_ref : (1, Hp)     final-layer weight row (resident)
    # b4_ref    : (1, 1)      final bias scalar (SMEM)
    # out_ref   : (1, TB)     lane-dense output row for this tile
    x = state_ref[...]                                              # (Sd, TB)

    h = jnp.dot(w1t_ref[...], x, preferred_element_type=jnp.float32)
    h = jnp.maximum(h + bcol_ref[:, 0:1], 0.0)                      # (Hp, TB)

    h = jnp.dot(w23t_ref[0], h, preferred_element_type=jnp.float32)
    h = jnp.maximum(h + bcol_ref[:, 1:2], 0.0)

    h = jnp.dot(w23t_ref[1], h, preferred_element_type=jnp.float32)
    h = jnp.maximum(h + bcol_ref[:, 2:3], 0.0)

    # Final layer: natural (1, Hp) @ (Hp, TB) matmul — no transpose needed.
    y = jnp.dot(w4row_ref[...], h, preferred_element_type=jnp.float32)
    out_ref[...] = (y + b4_ref[0, 0]).astype(out_ref.dtype)


# ---------------------------------------------------------------------------
# Parameter packing: raw (in, out) weights -> transposed, hidden-padded slabs.
# Call ONCE when params change; do not call per forward step.
# ---------------------------------------------------------------------------
def _pad2d(a, rows, cols):
    out = jnp.zeros((rows, cols), jnp.float32)
    return out.at[: a.shape[0], : a.shape[1]].set(a.astype(jnp.float32))


def pack_params(params):
    w1, b1 = params["w1"], params["b1"]
    w2, b2 = params["w2"], params["b2"]
    w3, b3 = params["w3"], params["b3"]
    w4, b4 = params["w4"], params["b4"]
    state_dim, hidden = w1.shape
    # Lane multiple of 128. (On v6e/v7x, hiddens > 128 could be padded to 256
    # multiples to fill the 256-wide MXU once the kernel stops being
    # overhead-bound; 128 is the native v5e tile so we keep the minimum pad.)
    hp = _round_up(hidden, 128)

    # NOTE: storing these slabs in bfloat16 (with f32 accumulation in-kernel)
    # would halve weight VMEM and the batch-scaling HBM traffic; kept f32 here
    # to match the f32 PyTorch reference numerics.
    w1t = _pad2d(w1.T, hp, state_dim)                              # (Hp, Sd)
    w23t = jnp.stack([_pad2d(w2.T, hp, hp),
                      _pad2d(w3.T, hp, hp)], axis=0)               # (2, Hp, Hp)
    bcol = jnp.concatenate([_pad2d(b1.reshape(-1, 1), hp, 1),
                            _pad2d(b2.reshape(-1, 1), hp, 1),
                            _pad2d(b3.reshape(-1, 1), hp, 1)], axis=1)  # (Hp, 3)
    w4row = _pad2d(w4.T, 1, hp)                                    # (1, Hp)
    b4s = jnp.asarray(b4, jnp.float32).reshape(1, 1)
    return {"w1t": w1t, "w23t": w23t, "bcol": bcol, "w4row": w4row, "b4": b4s}


# ---------------------------------------------------------------------------
# Tile selection: large lane-dense tiles, >= 2 grid steps for moderate/large B.
# ---------------------------------------------------------------------------
_MAX_TB = 4096  # 16*4096*4 B state tile, (128,4096) f32 activations ~ 2 MiB


def _choose_tb(batch):
    if batch <= 128:
        return batch                      # single block == full lane extent
    # Aim for two balanced tiles (keeps both v7x TensorCores busy through the
    # "parallel" grid axis); cap the tile so activations stay small in VMEM.
    half = _round_up(pl.cdiv(batch, 2), 128)
    return min(half, _MAX_TB)


# ---------------------------------------------------------------------------
# Forward wrapper (jit this; pass the pre-packed params in).
# ---------------------------------------------------------------------------
def value_network_forward(state, packed):
    """state: (B, state_dim) float32. packed: output of pack_params()."""
    B, state_dim = state.shape
    hp = packed["w1t"].shape[0]
    tb = _choose_tb(B)
    nb = pl.cdiv(B, tb)                   # ragged last block handled by Pallas

    # Batch on the lane axis for the whole kernel.
    state_t = state.astype(jnp.float32).T                          # (Sd, B)

    flops = 2 * B * (state_dim * hp + 2 * hp * hp + hp)
    bytes_accessed = 4 * (state_t.size + packed["w1t"].size + packed["w23t"].size
                          + packed["bcol"].size + packed["w4row"].size + 1 + B)

    out = pl.pallas_call(
        _value_net_kernel,
        out_shape=jax.ShapeDtypeStruct((1, B), jnp.float32),
        grid=(nb,),
        in_specs=[
            pl.BlockSpec((state_dim, tb), lambda i: (0, i)),       # state tile (pipelined)
            # Resident weight/bias slabs (constant index_maps). For large
            # hidden dims on v7x add pipeline_mode=pl.Buffered(1) + an explicit
            # vmem_limit_bytes; irrelevant at Hp=128.
            pl.BlockSpec((hp, state_dim), lambda i: (0, 0)),       # w1^T
            pl.BlockSpec((2, hp, hp), lambda i: (0, 0, 0)),        # w2^T, w3^T
            pl.BlockSpec((hp, 3), lambda i: (0, 0)),               # b1|b2|b3 columns
            pl.BlockSpec((1, hp), lambda i: (0, 0)),               # w4 row
            pl.BlockSpec(memory_space=pltpu.MemorySpace.SMEM),     # b4 scalar
        ],
        out_specs=pl.BlockSpec((1, tb), lambda i: (0, i)),         # lane-dense output
        compiler_params=pltpu.CompilerParams(
            dimension_semantics=("parallel",)),
        cost_estimate=pl.CostEstimate(flops=flops, transcendentals=0,
                                      bytes_accessed=bytes_accessed),
    )(state_t, packed["w1t"], packed["w23t"], packed["bcol"],
      packed["w4row"], packed["b4"])

    return out.reshape(B, 1)


# ---------------------------------------------------------------------------
# Deterministic synthetic init mirroring nn.Linear shapes.
# PyTorch Linear stores weight as (out, in); we keep (in, out) here.
# ---------------------------------------------------------------------------
def init_params(key, state_dim, hidden_dim):
    def linear(k, fan_in, fan_out):
        kw, kb = jax.random.split(k)
        bound = 1.0 / jnp.sqrt(fan_in)
        w = jax.random.uniform(kw, (fan_in, fan_out), jnp.float32, -bound, bound)
        b = jax.random.uniform(kb, (1, fan_out), jnp.float32, -bound, bound)
        return w, b

    k1, k2, k3, k4 = jax.random.split(key, 4)
    w1, b1 = linear(k1, state_dim, hidden_dim)
    w2, b2 = linear(k2, hidden_dim, hidden_dim)
    w3, b3 = linear(k3, hidden_dim, hidden_dim)
    # linear4 uses linear_weights_init (small-scale init) in the reference.
    kw4, kb4 = jax.random.split(k4)
    w4 = jax.random.uniform(kw4, (hidden_dim, 1), jnp.float32, -3e-3, 3e-3)
    b4 = jax.random.uniform(kb4, (1, 1), jnp.float32, -3e-3, 3e-3)
    return {"w1": w1, "b1": b1, "w2": w2, "b2": b2,
            "w3": w3, "b3": b3, "w4": w4, "b4": b4}


def _reference_forward(state, p):
    x = jnp.maximum(state @ p["w1"] + p["b1"], 0.0)
    x = jnp.maximum(x @ p["w2"] + p["b2"], 0.0)
    x = jnp.maximum(x @ p["w3"] + p["b3"], 0.0)
    return x @ p["w4"] + p["b4"]


if __name__ == "__main__":
    key = jax.random.PRNGKey(0)
    k_state, k_params, k_big = jax.random.split(key, 3)

    batch = 8          # small RL batch (single-tile path)
    state_dim = 16     # state_space.shape == (16,)
    hidden_dim = 32

    params = init_params(k_params, state_dim, hidden_dim)
    packed = pack_params(params)              # pack ONCE, outside the forward
    fwd = jax.jit(value_network_forward)      # jitted forward, packed params reused

    # --- small batch (single grid step, block == full extents) ---
    state = jax.random.normal(k_state, (batch, state_dim), jnp.float32)
    out = jax.block_until_ready(fwd(state, packed))
    ref = _reference_forward(state, params)
    assert out.shape == (batch, 1), out.shape
    err = float(jnp.max(jnp.abs(out - ref)))
    # Tolerance allows for MXU default-precision differences vs the XLA reference.
    assert err < 1e-3, f"small-batch mismatch vs reference: max abs err {err}"

    # --- larger, non-divisible batch (2 parallel tiles + ragged last block) ---
    big_batch = 300
    big_state = jax.random.normal(k_big, (big_batch, state_dim), jnp.float32)
    big_out = jax.block_until_ready(fwd(big_state, packed))
    big_ref = _reference_forward(big_state, params)
    assert big_out.shape == (big_batch, 1), big_out.shape
    big_err = float(jnp.max(jnp.abs(big_out - big_ref)))
    assert big_err < 1e-3, f"tiled-batch mismatch vs reference: max abs err {big_err}"

    print("KERNEL_OK")
</pallas_src>

<mosaic_0001>
module attributes {stable_mosaic.version = 11 : i64} {
  func.func @_value_net_kernel(%arg0: i32, %arg1: memref<16x8xf32, #tpu.memory_space<vmem>>, %arg2: memref<128x16xf32, #tpu.memory_space<vmem>>, %arg3: memref<2x128x128xf32, #tpu.memory_space<vmem>>, %arg4: memref<128x3xf32, #tpu.memory_space<vmem>>, %arg5: memref<1x128xf32, #tpu.memory_space<vmem>>, %arg6: memref<1x1xf32, #tpu.memory_space<smem>>, %arg7: memref<1x8xf32, #tpu.memory_space<vmem>>) attributes {dimension_semantics = [#tpu.dimension_semantics<parallel>], iteration_bounds = array<i64: 1>, scalar_prefetch = 0 : i64, scratch_operands = 0 : i64, tpu.core_type = #tpu.core_type<tc>, window_params = [{transform_indices = @transform_0, window_bounds = array<i64: 16, 8>}, {pipeline_mode = #tpu.pipeline_mode<synchronous>, transform_indices = @transform_1, window_bounds = array<i64: 128, 16>}, {pipeline_mode = #tpu.pipeline_mode<synchronous>, transform_indices = @transform_2, window_bounds = array<i64: 2, 128, 128>}, {pipeline_mode = #tpu.pipeline_mode<synchronous>, transform_indices = @transform_3, window_bounds = array<i64: 128, 3>}, {pipeline_mode = #tpu.pipeline_mode<synchronous>, transform_indices = @transform_4, window_bounds = array<i64: 1, 128>}, {transform_indices = @transform_5, window_bounds = array<i64: 1, 1>}, {transform_indices = @transform_6, window_bounds = array<i64: 1, 8>}]} {
    %c0 = arith.constant 0 : index
    %c0_0 = arith.constant 0 : index
    %0 = vector.load %arg1[%c0, %c0_0] : memref<16x8xf32, #tpu.memory_space<vmem>>, vector<16x8xf32>
    %c0_1 = arith.constant 0 : index
    %c0_2 = arith.constant 0 : index
    %1 = vector.load %arg2[%c0_1, %c0_2] : memref<128x16xf32, #tpu.memory_space<vmem>>, vector<128x16xf32>
    %cst = arith.constant dense<0.000000e+00> : vector<128x8xf32>
    %2 = tpu.matmul %1, %0, %cst {dimension_numbers = #tpu.dot_dimension_numbers<[1], [0], [0], [1], [0, 0, 1, 1], [], []>} : vector<128x16xf32>, vector<16x8xf32>, vector<128x8xf32> -> vector<128x8xf32>
    %c0_3 = arith.constant 0 : index
    %c0_4 = arith.constant 0 : index
    %3 = vector.load %arg4[%c0_3, %c0_4] : memref<128x3xf32, #tpu.memory_space<vmem>>, vector<128x1xf32>
    %4 = vector.broadcast %3 : vector<128x1xf32> to vector<128x8xf32>
    %5 = arith.addf %2, %4 : vector<128x8xf32>
    %cst_5 = arith.constant 0.000000e+00 : f32
    %6 = vector.broadcast %cst_5 : f32 to vector<128x8xf32>
    %7 = arith.maximumf %5, %6 : vector<128x8xf32>
    %c0_6 = arith.constant 0 : index
    %c0_7 = arith.constant 0 : index
    %c0_8 = arith.constant 0 : index
    %8 = vector.load %arg3[%c0_6, %c0_7, %c0_8] : memref<2x128x128xf32, #tpu.memory_space<vmem>>, vector<1x128x128xf32>
    %9 = vector.shape_cast %8 : vector<1x128x128xf32> to vector<128x128xf32>
    %cst_9 = arith.constant dense<0.000000e+00> : vector<128x8xf32>
    %10 = tpu.matmul %9, %7, %cst_9 {dimension_numbers = #tpu.dot_dimension_numbers<[1], [0], [0], [1], [0, 0, 1, 1], [], []>} : vector<128x128xf32>, vector<128x8xf32>, vector<128x8xf32> -> vector<128x8xf32>
    %c0_10 = arith.constant 0 : index
    %c1 = arith.constant 1 : index
    %11 = vector.load %arg4[%c0_10, %c1] : memref<128x3xf32, #tpu.memory_space<vmem>>, vector<128x1xf32>
    %12 = vector.broadcast %11 : vector<128x1xf32> to vector<128x8xf32>
    %13 = arith.addf %10, %12 : vector<128x8xf32>
    %cst_11 = arith.constant 0.000000e+00 : f32
    %14 = vector.broadcast %cst_11 : f32 to vector<128x8xf32>
    %15 = arith.maximumf %13, %14 : vector<128x8xf32>
    %c1_12 = arith.constant 1 : index
    %c0_13 = arith.constant 0 : index
    %c0_14 = arith.constant 0 : index
    %16 = vector.load %arg3[%c1_12, %c0_13, %c0_14] : memref<2x128x128xf32, #tpu.memory_space<vmem>>, vector<1x128x128xf32>
    %17 = vector.shape_cast %16 : vector<1x128x128xf32> to vector<128x128xf32>
    %cst_15 = arith.constant dense<0.000000e+00> : vector<128x8xf32>
    %18 = tpu.matmul %17, %15, %cst_15 {dimension_numbers = #tpu.dot_dimension_numbers<[1], [0], [0], [1], [0, 0, 1, 1], [], []>} : vector<128x128xf32>, vector<128x8xf32>, vector<128x8xf32> -> vector<128x8xf32>
    %c0_16 = arith.constant 0 : index
    %c2 = arith.constant 2 : index
    %19 = vector.load %arg4[%c0_16, %c2] : memref<128x3xf32, #tpu.memory_space<vmem>>, vector<128x1xf32>
    %20 = vector.broadcast %19 : vector<128x1xf32> to vector<128x8xf32>
    %21 = arith.addf %18, %20 : vector<128x8xf32>
    %cst_17 = arith.constant 0.000000e+00 : f32
    %22 = vector.broadcast %cst_17 : f32 to vector<128x8xf32>
    %23 = arith.maximumf %21, %22 : vector<128x8xf32>
    %c0_18 = arith.constant 0 : index
    %c0_19 = arith.constant 0 : index
    %24 = vector.load %arg5[%c0_18, %c0_19] : memref<1x128xf32, #tpu.memory_space<vmem>>, vector<1x128xf32>
    %cst_20 = arith.constant dense<0.000000e+00> : vector<1x8xf32>
    %25 = tpu.matmul %24, %23, %cst_20 {dimension_numbers = #tpu.dot_dimension_numbers<[1], [0], [0], [1], [0, 0, 1, 1], [], []>} : vector<1x128xf32>, vector<128x8xf32>, vector<1x8xf32> -> vector<1x8xf32>
    %c0_21 = arith.constant 0 : index
    %c0_22 = arith.constant 0 : index
    %26 = memref.load %arg6[%c0_21, %c0_22] : memref<1x1xf32, #tpu.memory_space<smem>>
    %27 = vector.broadcast %26 : f32 to vector<1x8xf32>
    %28 = arith.addf %25, %27 : vector<1x8xf32>
    %c0_23 = arith.constant 0 : index
    %c0_24 = arith.constant 0 : index
    %29 = vector.load %arg7[%c0_23, %c0_24] : memref<1x8xf32, #tpu.memory_space<vmem>>, vector<1x8xf32>
    tpu.vector_store %arg7[%c0_23, %c0_24], %28 {strides = array<i32>} : memref<1x8xf32, #tpu.memory_space<vmem>>, vector<1x8xf32>,
    return
  }
  func.func @transform_0(%arg0: i32) -> (i32, i32) {
    %c0_i32 = arith.constant 0 : i32
    %c0_i32_0 = arith.constant 0 : i32
    return %c0_i32, %arg0 : i32, i32
  }
  func.func @transform_1(%arg0: i32) -> (i32, i32) {
    %c0_i32 = arith.constant 0 : i32
    %c0_i32_0 = arith.constant 0 : i32
    %c0_i32_1 = arith.constant 0 : i32
    return %c0_i32, %c0_i32_0 : i32, i32
  }
  func.func @transform_2(%arg0: i32) -> (i32, i32, i32) {
    %c0_i32 = arith.constant 0 : i32
    %c0_i32_0 = arith.constant 0 : i32
    %c0_i32_1 = arith.constant 0 : i32
    %c0_i32_2 = arith.constant 0 : i32
    return %c0_i32, %c0_i32_0, %c0_i32_1 : i32, i32, i32
  }
  func.func @transform_3(%arg0: i32) -> (i32, i32) {
    %c0_i32 = arith.constant 0 : i32
    %c0_i32_0 = arith.constant 0 : i32
    %c0_i32_1 = arith.constant 0 : i32
    return %c0_i32, %c0_i32_0 : i32, i32
  }
  func.func @transform_4(%arg0: i32) -> (i32, i32) {
    %c0_i32 = arith.constant 0 : i32
    %c0_i32_0 = arith.constant 0 : i32
    %c0_i32_1 = arith.constant 0 : i32
    return %c0_i32, %c0_i32_0 : i32, i32
  }
  func.func @transform_5(%arg0: i32) -> (i32, i32) {
    %c0_i32 = arith.constant 0 : i32
    %c0_i32_0 = arith.constant 0 : i32
    %c0_i32_1 = arith.constant 0 : i32
    return %c0_i32, %c0_i32_0 : i32, i32
  }
  func.func @transform_6(%arg0: i32) -> (i32, i32) {
    %c0_i32 = arith.constant 0 : i32
    %c0_i32_0 = arith.constant 0 : i32
    return %c0_i32, %arg0 : i32, i32
  }
}

</mosaic_0001>

<bundles_post_ra>
// kernel: value_network_forward.1
= control target key start
LH: loop header
LB: loop body
LE: loop exit
PB: predicated region body
PF: predicated region fallthrough
CT: control target
= control target key end

     0   :  { %vm139_vm0 = vcmask 130048   ;;  %v1261_v4 = vmov 0   ;;  %s1658_s0 = inlined_call_operand.vmem [shape: f32[16,8], index: 0, kind: input, shape index: {}]   ;;  %s1659_s1 = inlined_call_operand.vmem [shape: f32[128,16], index: 1, kind: input, shape index: {}]   ;;  %s1660_s2 = inlined_call_operand.vmem [shape: f32[2,128,128], index: 2, kind: input, shape index: {}]   ;;  %s1661_s3 = inlined_call_operand.vmem [shape: f32[128,3], index: 3, kind: input, shape index: {}]   ;;  %s1662_s4 = inlined_call_operand.vmem [shape: f32[1,128], index: 4, kind: input, shape index: {}]   ;;  %s1663_s5 = inlined_call_operand.<no memory space> [shape: f32[1,1], index: 5, kind: input, shape index: {}]   ;;  %s1664_s6 = inlined_call_operand.hbm [shape: f32[1,8], index: 6, kind: output, shape index: {}]  }
   0x1   :  { %v26_v0 = vld [vmem:[%s1658_s0 + $0x8] sm:$0xff]  ;;  %v25_v1 = vld [vmem:[%s1658_s0] sm:$0xff]  ;;  %1233 = vset.pattern.permute.xlu0 %v1261_v4  ;;  %v29_v5 = vld [vmem:[%s1659_s1 + $0x10] sm:$0xff]  ;;  %1234 = vset.pattern.permute.xlu1 %v1261_v4 }
   0x2   :  { %v27_v2 = vld [vmem:[%s1659_s1] sm:$0xff]  ;;  %1052 = vmatprep.subr.mxu0 %v26_v0  ;;  %v28_v3 = vld [vmem:[%s1659_s1 + $0x8] sm:$0xff]  ;;  %v30_v6 = vld [vmem:[%s1659_s1 + $0x18] sm:$0xff] }
   0x3   :  { %1056 = vmatprep.mubr.msk.f32.mxu0 %vm139_vm0, %v27_v2  ;;  %1053 = vmatpush3.msra.mxu0 %v26_v0  ;;  %v1326_v7 = vld [vmem:[%s1661_s3 + $0x78] sm:$0xff]  ;;  %v1331_v8 = vld [vmem:[%s1661_s3 + $0x68] sm:$0xff]  ;;  %v31_v9 = vld [vmem:[%s1659_s1 + $0x20] sm:$0xff] }
   0x4   :  { %1054 = vmatprep.subr.mxu0 %v25_v1  ;;  %136 = vperm.xlu0 %1233, %v1326_v7   ;;  %v1341_v10 = vld [vmem:[%s1661_s3 + $0x70] sm:$0xff]  ;;  %v1346_v11 = vld [vmem:[%s1661_s3 + $0x60] sm:$0xff]  ;;  %v32_v12 = vld [vmem:[%s1659_s1 + $0x28] sm:$0xff] }
   0x5   :  { %1055 = vmatpush3.msra.mxu0 %v25_v1  ;;  %126 = vperm.xlu1 %1234, %v1331_v8   ;;  %v33_v13 = vld [vmem:[%s1659_s1 + $0x30] sm:$0xff] }
   0x6   :  { %1057 = vmatmul.mubr.msk.f32.vlgmr.msra.gmra.mxu0 %vm139_vm0, %v28_v3 }
   0x7   :  { %1059 = vmatprep.mubr.msk.f32.mxu0 %vm139_vm0, %v29_v5 }
   0x8   :  { %131 = vperm.xlu0 %1233, %v1341_v10  }
   0x9   :  { %121 = vperm.xlu1 %1234, %v1346_v11  }
   0xa   :  { %1060 = vmatmul.mubr.msk.f32.gmra.mxu0 %vm139_vm0, %v30_v6 }
   0xb   :  { %1062 = vmatprep.mubr.msk.f32.mxu0 %vm139_vm0, %v31_v9 }
   0xc   :  { %12 = vsyncpa [#allocation4], 0  ;;  %v1361_v14 = vld [vmem:[%s1661_s3 + $0x58] sm:$0xff]  ;;  %v1366_v15 = vld [vmem:[%s1661_s3 + $0x50] sm:$0xff]  ;;  %v1262_v36 = vmov 1   ;;  %vm1265_vm1 = vmmov 0  }
   0xd   :  { %v34_v16 = vld [vmem:[%s1659_s1 + $0x38] sm:$0xff]  ;;  %v35_v17 = vld [vmem:[%s1659_s1 + $0x40] sm:$0xff]  ;;  %116 = vperm.xlu0 %1233, %v1361_v14   ;;  %111 = vperm.xlu1 %1234, %v1366_v15   ;;  %v1381_v18 = vld [vmem:[%s1661_s3 + $0x48] sm:$0xff]  ;;  %s1266_s25 = smov [#allocation3]   ;;  %vm905_vm2 = vcmask 57344  }
   0xe   :  { %1063 = vmatmul.mubr.msk.f32.gmra.mxu0 %vm139_vm0, %v32_v12  ;;  %v1386_v19 = vld [vmem:[%s1661_s3 + $0x40] sm:$0xff]  ;;  %v36_v20 = vld [vmem:[%s1659_s1 + $0x48] sm:$0xff]  ;;  %v37_v21 = vld [vmem:[%s1659_s1 + $0x50] sm:$0xff]  ;;  %s913_s26 = sshll.u32 %s1266_s25, 4  ;;  %s914_s26 = int_to_ptr.vmem [resolvable:$true] %s913_s26 }
   0xf   :  { %1065 = vmatprep.mubr.msk.f32.mxu0 %vm139_vm0, %v33_v13  ;;  %v1401_v22 = vld [vmem:[%s1661_s3 + $0x38] sm:$0xff]  ;;  %v1406_v23 = vld [vmem:[%s1661_s3 + $0x30] sm:$0xff]  ;;  %v39_v25 = vld [vmem:[%s1659_s1 + $0x60] sm:$0xff]  ;;  %s1239_s27 = scalar_lea.vmem %s914_s26, 16  ;;  %s1243_s28 = scalar_lea.vmem %s914_s26, 32 }
  0x10   :  { %v38_v24 = vld [vmem:[%s1659_s1 + $0x58] sm:$0xff]  ;;  %v1421_v26 = vld [vmem:[%s1661_s3 + $0x28] sm:$0xff]  ;;  %v1426_v27 = vld [vmem:[%s1661_s3 + $0x20] sm:$0xff]  ;;  %p1240_p0 = scmp.ne.s32.totalorder %s914_s26, %s1239_s27  ;;  %p1244_p1 = scmp.lt.s32.totalorder %s914_s26, %s914_s26 }
  0x11   :  { %106 = vperm.xlu0 %1233, %v1381_v18   ;;  %101 = vperm.xlu1 %1234, %v1386_v19   ;;  %v40_v28 = vld [vmem:[%s1659_s1 + $0x68] sm:$0xff]  ;;  %v41_v29 = vld [vmem:[%s1659_s1 + $0x70] sm:$0xff]  ;;  %v1441_v30 = vld [vmem:[%s1661_s3 + $0x18] sm:$0xff]  ;;  %p1245_p2 = scmp.lt.s32.totalorder %s1243_s28, %s1239_s27 }
  0x12   :  { %1066 = vmatmul.mubr.msk.f32.gmra.mxu0 %vm139_vm0, %v34_v16  ;;  %v1446_v31 = vld [vmem:[%s1661_s3 + $0x10] sm:$0xff]  ;;  %v42_v32 = vld [vmem:[%s1659_s1 + $0x78] sm:$0xff]  ;;  %v1458_v33 = vld [vmem:[%s1661_s3 + $0x8] sm:$0xff] }
  0x13   :  { %1068 = vmatprep.mubr.msk.f32.mxu0 %vm139_vm0, %v35_v17  ;;  %v1463_v34 = vld [vmem:[%s1661_s3] sm:$0xff]  ;;  %p1246_p3 = por %p1245_p2, %p1244_p1 }
  0x14   :  { %v349_v35 = vld [vmem:[%s1660_s2] sm:$0xff] }
  0x15   :  { %96 = vperm.xlu0 %1233, %v1401_v22   ;;  %91 = vperm.xlu1 %1234, %v1406_v23   ;;  %p1247_p4 = pnand %p1246_p3, %p1240_p0 }
  0x16   :  { %1069 = vmatmul.mubr.msk.f32.gmra.mxu0 %vm139_vm0, %v36_v20  ;;  %1112 = vmatprep.mubr.f32.mxu1 %v349_v35 }
  0x17   :  { %1071 = vmatprep.mubr.msk.f32.mxu0 %vm139_vm0, %v37_v21 }
  0x19   :  { %86 = vperm.xlu0 %1233, %v1421_v26   ;;  %81 = vperm.xlu1 %1234, %v1426_v27  }
  0x1a   :  { %1072 = vmatmul.mubr.msk.f32.gmra.mxu0 %vm139_vm0, %v38_v24 }
  0x1b   :  { %1074 = vmatprep.mubr.msk.f32.mxu0 %vm139_vm0, %v39_v25 }
  0x1d   :  { %76 = vperm.xlu0 %1233, %v1441_v30   ;;  %71 = vperm.xlu1 %1234, %v1446_v31  }
  0x1e   :  { %1075 = vmatmul.mubr.msk.f32.gmra.mxu0 %vm139_vm0, %v40_v28 }
  0x1f   :  { %1077 = vmatprep.mubr.msk.f32.mxu0 %vm139_vm0, %v41_v29 }
  0x21   :  { %66 = vperm.xlu0 %1233, %v1458_v33   ;;  %61 = vperm.xlu1 %1234, %v1463_v34  }
  0x22   :  { %1078 = vmatmul.mubr.msk.f32.gmra.mxu0 %vm139_vm0, %v42_v32 }
  0x25   :  { %1236 = vset.pattern.permute.xlu1 %v1262_v36  ;;  %1235 = vset.pattern.permute.xlu0 %v1262_v36 }
  0x26   :  { %422 = vperm.xlu1 %1236, %v1341_v10   ;;  %426 = vperm.xlu0 %1235, %v1326_v7  }
  0x2a   :  { %418 = vperm.xlu1 %1236, %v1331_v8   ;;  %414 = vperm.xlu0 %1235, %v1346_v11  }
  0x2e   :  { %410 = vperm.xlu1 %1236, %v1361_v14   ;;  %406 = vperm.xlu0 %1235, %v1366_v15  }
  0x32   :  { %402 = vperm.xlu1 %1236, %v1381_v18   ;;  %398 = vperm.xlu0 %1235, %v1386_v19  }
  0x36   :  { %394 = vperm.xlu1 %1236, %v1401_v22   ;;  %390 = vperm.xlu0 %1235, %v1406_v23  }
  0x3a   :  { %386 = vperm.xlu1 %1236, %v1421_v26   ;;  %382 = vperm.xlu0 %1235, %v1426_v27  }
  0x3e   :  { %378 = vperm.xlu1 %1236, %v1441_v30   ;;  %374 = vperm.xlu0 %1235, %v1446_v31  }
  0x42   :  { %370 = vperm.xlu1 %1236, %v1458_v33   ;;  %366 = vperm.xlu0 %1235, %v1463_v34  }
  0x7f   :  { %v137_v42 = vpop.permute.xlu0 %136 }
  0x80   :  { %v127_v44 = vpop.permute.xlu1 %126 }
  0x83   :  { %v132_v47 = vpop.permute.xlu0 %131 }
  0x84   :  { %v122_v49 = vpop.permute.xlu1 %121 }
  0x88   :  { %v117_v52 = vpop.permute.xlu0 %116  ;;  %v112_v54 = vpop.permute.xlu1 %111 }
  0x8c   :  { %v107_v57 = vpop.permute.xlu0 %106  ;;  %v102_v60 = vpop.permute.xlu1 %101 }
  0x90   :  { %v97_v3 = vpop.permute.xlu0 %96  ;;  %v92_v6 = vpop.permute.xlu1 %91 }
  0x94   :  { %v87_v17 = vpop.permute.xlu0 %86  ;;  %v82_v24 = vpop.permute.xlu1 %81 }
  0x98   :  { %v77_v35 = vpop.permute.xlu0 %76 }
  0xc6   :  { %v1487_v37 = vpop.f32.mrf.mxu0 }
  0xc8   :  { %v1489_v38 = vpop.f32.mrf.mxu0 }
  0xca   :  { %v1491_v39 = vpop.f32.mrf.mxu0 }
  0xcc   :  { %v1493_v40 = vpop.f32.mrf.mxu0 }
  0xce   :  { %v1064_v41 = vpop.f32.mrf.mxu0 }
  0xcf   :  { %v280_v36 = vadd.f32 %v1064_v41, %v87_v17 }
  0xd0   :  { %v274_v43 = vpop.f32.mrf.mxu0 }
  0xd2   :  { %v1067_v45 = vpop.f32.mrf.mxu0 }
  0xd3   :  { %v290_v25 = vadd.f32 %v1067_v45, %v97_v3  ;;  %v338_v45 = vmax.f32 %v280_v36, 0.0  ;;  %v364_v3 = vld [vmem:[%s1660_s2 + $0x78] sm:$0xff] }
  0xd4   :  { %v284_v46 = vpop.f32.mrf.mxu0 }
  0xd5   :  { %v285_v29 = vadd.f32 %v284_v46, %v92_v6 }
  0xd6   :  { %v1070_v48 = vpop.f32.mrf.mxu0 }
  0xd7   :  { %v300_v13 = vadd.f32 %v1070_v48, %v107_v57  ;;  %v339_v48 = vmax.f32 %v285_v29, 0.0  ;;  %v354_v57 = vld [vmem:[%s1660_s2 + $0x28] sm:$0xff] }
  0xd8   :  { %v294_v50 = vpop.f32.mrf.mxu0 }
  0xd9   :  { %v295_v20 = vadd.f32 %v294_v50, %v102_v60  ;;  %v342_v28 = vmax.f32 %v300_v13, 0.0  ;;  %v67_v50 = vpop.permute.xlu0 %66  ;;  %v357_v60 = vld [vmem:[%s1660_s2 + $0x40] sm:$0xff] }
  0xda   :  { %v1073_v51 = vpop.f32.mrf.mxu0  ;;  %v260_v41 = vadd.f32 %v1487_v37, %v67_v50  ;;  %v351_v37 = vld [vmem:[%s1660_s2 + $0x10] sm:$0xff] }
  0xdb   :  { %v310_v4 = vadd.f32 %v1073_v51, %v117_v52  ;;  %v341_v32 = vmax.f32 %v295_v20, 0.0 }
  0xdc   :  { %v304_v53 = vpop.f32.mrf.mxu0 }
  0xdd   :  { %v305_v9 = vadd.f32 %v304_v53, %v112_v54  ;;  %v344_v16 = vmax.f32 %v310_v4, 0.0  ;;  %v937_v4 = vld [vmem:[%s1660_s2 + $0x80] sm:$0xff] }
  0xde   :  { %v1076_v55 = vpop.f32.mrf.mxu0  ;;  %1168 = vmatprep.mubr.f32.mxu0 %v937_v4 }
  0xdf   :  { %v320_v62 = vadd.f32 %v1076_v55, %v127_v44  ;;  %v343_v21 = vmax.f32 %v305_v9, 0.0  ;;  %v72_v44 = vpop.permute.xlu1 %71 }
  0xe0   :  { %v314_v56 = vpop.f32.mrf.mxu0  ;;  %v265_v46 = vadd.f32 %v1493_v40, %v72_v44  ;;  %v350_v40 = vld [vmem:[%s1660_s2 + $0x8] sm:$0xff] }
  0xe1   :  { %v315_v1 = vadd.f32 %v314_v56, %v122_v49  ;;  %v346_v5 = vmax.f32 %v320_v62, 0.0  ;;  %v270_v49 = vadd.f32 %v1491_v39, %v77_v35  ;;  %v334_v39 = vmax.f32 %v260_v41, 0.0  ;;  %v353_v56 = vld [vmem:[%s1660_s2 + $0x20] sm:$0xff]  ;;  %v359_v62 = vld [vmem:[%s1660_s2 + $0x50] sm:$0xff] }
  0xe2   :  { %v1079_v58 = vpop.f32.mrf.mxu0  ;;  %v335_v54 = vmax.f32 %v265_v46, 0.0 }
  0xe3   :  { %v330_v59 = vadd.f32 %v1079_v58, %v137_v42  ;;  %v345_v12 = vmax.f32 %v315_v1, 0.0  ;;  %v340_v42 = vmax.f32 %v290_v25, 0.0  ;;  %v62_v52 = vpop.permute.xlu1 %61  ;;  %v336_v53 = vmax.f32 %v270_v49, 0.0  ;;  %v355_v58 = vld [vmem:[%s1660_s2 + $0x30] sm:$0xff]  ;;  %v362_v1 = vld [vmem:[%s1660_s2 + $0x68] sm:$0xff] }
  0xe4   :  { %v324_v61 = vpop.f32.mrf.mxu0 }
  0xe5   :  { %v348_v63 = vmax.f32 %v330_v59, 0.0  ;;  %v325_v0 = vadd.f32 %v324_v61, %v132_v47  ;;  %v275_v47 = vadd.f32 %v274_v43, %v82_v24  ;;  %v255_v43 = vadd.f32 %v1489_v38, %v62_v52  ;;  %v352_v38 = vld [vmem:[%s1660_s2 + $0x18] sm:$0xff]  ;;  %v358_v61 = vld [vmem:[%s1660_s2 + $0x48] sm:$0xff] }
  0xe6   :  { %v356_v59 = vld [vmem:[%s1660_s2 + $0x38] sm:$0xff] }
  0xe7   :  { %v347_v2 = vmax.f32 %v325_v0, 0.0  ;;  %1080 = vmatprep.subr.mxu1 %v348_v63  ;;  %v337_v51 = vmax.f32 %v275_v47, 0.0  ;;  %v333_v55 = vmax.f32 %v255_v43, 0.0  ;;  %v361_v0 = vld [vmem:[%s1660_s2 + $0x60] sm:$0xff] }
  0xe8   :  { %1081 = vmatpush3.msra.mxu1 %v348_v63  ;;  %v360_v63 = vld [vmem:[%s1660_s2 + $0x58] sm:$0xff] }
  0xe9   :  { %1082 = vmatprep.subr.mxu1 %v347_v2 }
  0xea   :  { %1083 = vmatpush3.msra.mxu1 %v347_v2  ;;  %v363_v2 = vld [vmem:[%s1660_s2 + $0x70] sm:$0xff] }
  0xeb   :  { %1084 = vmatprep.subr.mxu1 %v346_v5 }
  0xec   :  { %1085 = vmatpush3.msra.mxu1 %v346_v5  ;;  %v1263_v5 = vmov 2  }
  0xed   :  { %1086 = vmatprep.subr.mxu1 %v345_v12  ;;  %1237 = vset.pattern.permute.xlu1 %v1263_v5 }
  0xee   :  { %1087 = vmatpush3.msra.mxu1 %v345_v12  ;;  %1238 = vset.pattern.permute.xlu0 %v1263_v5 }
  0xef   :  { %1088 = vmatprep.subr.mxu1 %v344_v16  ;;  %668 = vperm.xlu1 %1237, %v1326_v7  }
  0xf0   :  { %1089 = vmatpush3.msra.mxu1 %v344_v16  ;;  %664 = vperm.xlu0 %1238, %v1341_v10  }
  0xf1   :  { %1090 = vmatprep.subr.mxu1 %v343_v21 }
  0xf2   :  { %1091 = vmatpush3.msra.mxu1 %v343_v21 }
  0xf3   :  { %1092 = vmatprep.subr.mxu1 %v342_v28  ;;  %660 = vperm.xlu1 %1237, %v1331_v8  }
  0xf4   :  { %1093 = vmatpush3.msra.mxu1 %v342_v28  ;;  %652 = vperm.xlu0 %1238, %v1361_v14  }
  0xf5   :  { %1094 = vmatprep.subr.mxu1 %v341_v32 }
  0xf6   :  { %1095 = vmatpush3.msra.mxu1 %v341_v32 }
  0xf7   :  { %1096 = vmatprep.subr.mxu1 %v340_v42  ;;  %656 = vperm.xlu1 %1237, %v1346_v11  }
  0xf8   :  { %1097 = vmatpush3.msra.mxu1 %v340_v42  ;;  %644 = vperm.xlu0 %1238, %v1381_v18  }
  0xf9   :  { %1098 = vmatprep.subr.mxu1 %v339_v48 }
  0xfa   :  { %1099 = vmatpush3.msra.mxu1 %v339_v48 }
  0xfb   :  { %1100 = vmatprep.subr.mxu1 %v338_v45  ;;  %648 = vperm.xlu1 %1237, %v1366_v15   ;;  %v423_v15 = vpop.permute.xlu1 %422 }
  0xfc   :  { %1101 = vmatpush3.msra.mxu1 %v338_v45  ;;  %636 = vperm.xlu0 %1238, %v1401_v22  }
  0xfd   :  { %1102 = vmatprep.subr.mxu1 %v337_v51 }
  0xfe   :  { %1103 = vmatpush3.msra.mxu1 %v337_v51 }
  0xff   :  { %1104 = vmatprep.subr.mxu1 %v336_v53  ;;  %640 = vperm.xlu1 %1237, %v1386_v19   ;;  %v427_v19 = vpop.permute.xlu0 %426 }
 0x100   :  { %1105 = vmatpush3.msra.mxu1 %v336_v53  ;;  %628 = vperm.xlu0 %1238, %v1421_v26   ;;  %v419_v26 = vpop.permute.xlu1 %418 }
 0x101   :  { %1106 = vmatprep.subr.mxu1 %v335_v54 }
 0x102   :  { %1107 = vmatpush3.msra.mxu1 %v335_v54 }
 0x103   :  { %1108 = vmatprep.subr.mxu1 %v334_v39  ;;  %632 = vperm.xlu1 %1237, %v1406_v23  }
 0x104   :  { %1109 = vmatpush3.msra.mxu1 %v334_v39  ;;  %620 = vperm.xlu0 %1238, %v1441_v30   ;;  %v415_v30 = vpop.permute.xlu0 %414 }
 0x105   :  { %1110 = vmatprep.subr.mxu1 %v333_v55 }
 0x106   :  { %1111 = vmatpush3.msra.mxu1 %v333_v55 }
 0x107   :  { %1113 = vmatmul.mubr.f32.vlgmr.msra.gmra.mxu1 %v350_v40  ;;  %624 = vperm.xlu1 %1237, %v1426_v27  }
 0x108   :  { %1115 = vmatprep.mubr.f32.mxu1 %v351_v37  ;;  %612 = vperm.xlu0 %1238, %v1458_v33   ;;  %v407_v9 = vpop.permute.xlu0 %406 }
 0x10b   :  { %1116 = vmatmul.mubr.f32.gmra.mxu1 %v352_v38  ;;  %616 = vperm.xlu1 %1237, %v1446_v31  }
 0x10c   :  { %1118 = vmatprep.mubr.f32.mxu1 %v353_v56  ;;  %v399_v21 = vpop.permute.xlu0 %398 }
 0x10f   :  { %1119 = vmatmul.mubr.f32.gmra.mxu1 %v354_v57  ;;  %608 = vperm.xlu1 %1237, %v1463_v34   ;;  %v411_v34 = vpop.permute.xlu1 %410 }
 0x110   :  { %1121 = vmatprep.mubr.f32.mxu1 %v355_v58  ;;  %v391_v47 = vpop.permute.xlu0 %390 }
 0x113   :  { %1122 = vmatmul.mubr.f32.gmra.mxu1 %v356_v59  ;;  %v403_v16 = vpop.permute.xlu1 %402 }
 0x114   :  { %1124 = vmatprep.mubr.f32.mxu1 %v357_v60  ;;  %v383_v41 = vpop.permute.xlu0 %382 }
 0x117   :  { %1125 = vmatmul.mubr.f32.gmra.mxu1 %v358_v61  ;;  %v395_v36 = vpop.permute.xlu1 %394 }
 0x118   :  { %1127 = vmatprep.mubr.f32.mxu1 %v359_v62  ;;  %v375_v38 = vpop.permute.xlu0 %374 }
 0x11b   :  { %1128 = vmatmul.mubr.f32.gmra.mxu1 %v360_v63  ;;  %v387_v46 = vpop.permute.xlu1 %386 }
 0x11c   :  { %1130 = vmatprep.mubr.f32.mxu1 %v361_v0  ;;  %v367_v63 = vpop.permute.xlu0 %366 }
 0x11f   :  { %1131 = vmatmul.mubr.f32.gmra.mxu1 %v362_v1  ;;  %v379_v55 = vpop.permute.xlu1 %378 }
 0x120   :  { %1133 = vmatprep.mubr.f32.mxu1 %v363_v2 }
 0x123   :  { %1134 = vmatmul.mubr.f32.gmra.mxu1 %v364_v3  ;;  %v371_v60 = vpop.permute.xlu1 %370 }
 0x1c7   :  { %v1563_v7 = vpop.f32.mrf.mxu1 }
 0x1c8   :  { %v501_v0 = vadd.f32 %v1563_v7, %v371_v60  ;;  %v939_v7 = vld [vmem:[%s1660_s2 + $0x90] sm:$0xff] }
 0x1c9   :  { %v1565_v8 = vpop.f32.mrf.mxu1 }
 0x1ca   :  { %v496_v2 = vadd.f32 %v1565_v8, %v367_v63  ;;  %v575_v4 = vmax.f32 %v501_v0, 0.0  ;;  %v940_v8 = vld [vmem:[%s1660_s2 + $0x98] sm:$0xff] }
 0x1cb   :  { %v1567_v10 = vpop.f32.mrf.mxu1 }
 0x1cc   :  { %v511_v58 = vadd.f32 %v1567_v10, %v379_v55  ;;  %v574_v5 = vmax.f32 %v496_v2, 0.0  ;;  %v938_v10 = vld [vmem:[%s1660_s2 + $0x88] sm:$0xff] }
 0x1cd   :  { %v1569_v11 = vpop.f32.mrf.mxu1 }
 0x1ce   :  { %v506_v61 = vadd.f32 %v1569_v11, %v375_v38  ;;  %v577_v1 = vmax.f32 %v511_v58, 0.0  ;;  %v941_v11 = vld [vmem:[%s1660_s2 + $0xa0] sm:$0xff] }
 0x1cf   :  { %v1120_v14 = vpop.f32.mrf.mxu1 }
 0x1d0   :  { %v521_v40 = vadd.f32 %v1120_v14, %v387_v46  ;;  %v576_v3 = vmax.f32 %v506_v61, 0.0  ;;  %v942_v14 = vld [vmem:[%s1660_s2 + $0xa8] sm:$0xff] }
 0x1d1   :  { %v515_v18 = vpop.f32.mrf.mxu1 }
 0x1d2   :  { %v516_v56 = vadd.f32 %v515_v18, %v383_v41  ;;  %v579_v59 = vmax.f32 %v521_v40, 0.0  ;;  %v944_v18 = vld [vmem:[%s1660_s2 + $0xb8] sm:$0xff] }
 0x1d3   :  { %v1123_v22 = vpop.f32.mrf.mxu1 }
 0x1d4   :  { %v531_v53 = vadd.f32 %v1123_v22, %v395_v36  ;;  %v578_v62 = vmax.f32 %v516_v56, 0.0  ;;  %v946_v22 = vld [vmem:[%s1660_s2 + $0xc8] sm:$0xff] }
 0x1d5   :  { %v525_v23 = vpop.f32.mrf.mxu1 }
 0x1d6   :  { %v526_v54 = vadd.f32 %v525_v23, %v391_v47  ;;  %v581_v37 = vmax.f32 %v531_v53, 0.0  ;;  %v947_v23 = vld [vmem:[%s1660_s2 + $0xd0] sm:$0xff] }
 0x1d7   :  { %v1126_v27 = vpop.f32.mrf.mxu1 }
 0x1d8   :  { %v541_v45 = vadd.f32 %v1126_v27, %v403_v16  ;;  %v580_v57 = vmax.f32 %v526_v54, 0.0  ;;  %v949_v27 = vld [vmem:[%s1660_s2 + $0xe0] sm:$0xff] }
 0x1d9   :  { %v535_v31 = vpop.f32.mrf.mxu1 }
 0x1da   :  { %v536_v51 = vadd.f32 %v535_v31, %v399_v21  ;;  %v583_v43 = vmax.f32 %v541_v45, 0.0  ;;  %v951_v31 = vld [vmem:[%s1660_s2 + $0xf0] sm:$0xff] }
 0x1db   :  { %v1129_v33 = vpop.f32.mrf.mxu1 }
 0x1dc   :  { %v551_v42 = vadd.f32 %v1129_v33, %v411_v34  ;;  %v582_v39 = vmax.f32 %v536_v51, 0.0  ;;  %v952_v33 = vld [vmem:[%s1660_s2 + $0xf8] sm:$0xff]  ;;  %v1264_v34 = vmov 0.0  }
 0x1dd   :  { %v545_v6 = vpop.f32.mrf.mxu1  ;;  %1192 = vmatprep.subr.mxu1 %v1264_v34  ;;  %1224 = vmatprep.mubr.msk.f32.mxu1 %vm1265_vm1, %v1264_v34 }
 0x1de   :  { %v546_v48 = vadd.f32 %v545_v6, %v407_v9  ;;  %v585_v50 = vmax.f32 %v551_v42, 0.0 }
 0x1df   :  { %v1132_v12 = vpop.f32.mrf.mxu1 }
 0x1e0   :  { %v561_v25 = vadd.f32 %v1132_v12, %v419_v26  ;;  %v584_v52 = vmax.f32 %v546_v48, 0.0  ;;  %v948_v26 = vld [vmem:[%s1660_s2 + $0xd8] sm:$0xff] }
 0x1e1   :  { %v555_v13 = vpop.f32.mrf.mxu1 }
 0x1e2   :  { %v556_v32 = vadd.f32 %v555_v13, %v415_v30  ;;  %v587_v44 = vmax.f32 %v561_v25, 0.0  ;;  %v950_v30 = vld [vmem:[%s1660_s2 + $0xe8] sm:$0xff]  ;;  %v669_v13 = vpop.permute.xlu1 %668 }
 0x1e3   :  { %v1135_v17 = vpop.f32.mrf.mxu1 }
 0x1e4   :  { %v571_v20 = vadd.f32 %v1135_v17, %v427_v19  ;;  %v586_v49 = vmax.f32 %v556_v32, 0.0  ;;  %v945_v19 = vld [vmem:[%s1660_s2 + $0xc0] sm:$0xff] }
 0x1e5   :  { %v565_v24 = vpop.f32.mrf.mxu1 }
 0x1e6   :  { %v589_v28 = vmax.f32 %v571_v20, 0.0  ;;  %v566_v29 = vadd.f32 %v565_v24, %v423_v15  ;;  %v943_v15 = vld [vmem:[%s1660_s2 + $0xb0] sm:$0xff]  ;;  %v661_v21 = vpop.permute.xlu1 %660 }
 0x1e8   :  { %v588_v35 = vmax.f32 %v566_v29, 0.0  ;;  %1136 = vmatprep.subr.mxu0 %v589_v28 }
 0x1e9   :  { %1137 = vmatpush3.msra.mxu0 %v589_v28  ;;  %v665_v28 = vpop.permute.xlu0 %664 }
 0x1ea   :  { %1138 = vmatprep.subr.mxu0 %v588_v35  ;;  %v657_v32 = vpop.permute.xlu1 %656 }
 0x1eb   :  { %1139 = vmatpush3.msra.mxu0 %v588_v35 }
 0x1ec   :  { %1140 = vmatprep.subr.mxu0 %v587_v44 }
 0x1ed   :  { %1141 = vmatpush3.msra.mxu0 %v587_v44  ;;  %v653_v42 = vpop.permute.xlu0 %652 }
 0x1ee   :  { %1142 = vmatprep.subr.mxu0 %v586_v49  ;;  %v649_v47 = vpop.permute.xlu1 %648 }
 0x1ef   :  { %1143 = vmatpush3.msra.mxu0 %v586_v49 }
 0x1f0   :  { %1144 = vmatprep.subr.mxu0 %v585_v50 }
 0x1f1   :  { %1145 = vmatpush3.msra.mxu0 %v585_v50  ;;  %v645_v45 = vpop.permute.xlu0 %644 }
 0x1f2   :  { %1146 = vmatprep.subr.mxu0 %v584_v52  ;;  %v641_v51 = vpop.permute.xlu1 %640 }
 0x1f3   :  { %1147 = vmatpush3.msra.mxu0 %v584_v52 }
 0x1f4   :  { %1148 = vmatprep.subr.mxu0 %v583_v43 }
 0x1f5   :  { %1149 = vmatpush3.msra.mxu0 %v583_v43  ;;  %v637_v55 = vpop.permute.xlu0 %636 }
 0x1f6   :  { %1150 = vmatprep.subr.mxu0 %v582_v39  ;;  %v633_v38 = vpop.permute.xlu1 %632 }
 0x1f7   :  { %1151 = vmatpush3.msra.mxu0 %v582_v39 }
 0x1f8   :  { %1152 = vmatprep.subr.mxu0 %v581_v37 }
 0x1f9   :  { %1153 = vmatpush3.msra.mxu0 %v581_v37  ;;  %v629_v60 = vpop.permute.xlu0 %628 }
 0x1fa   :  { %1154 = vmatprep.subr.mxu0 %v580_v57  ;;  %v625_v63 = vpop.permute.xlu1 %624 }
 0x1fb   :  { %1155 = vmatpush3.msra.mxu0 %v580_v57 }
 0x1fc   :  { %1156 = vmatprep.subr.mxu0 %v579_v59 }
 0x1fd   :  { %1157 = vmatpush3.msra.mxu0 %v579_v59 }
 0x1fe   :  { %1158 = vmatprep.subr.mxu0 %v578_v62 }
 0x1ff   :  { %1159 = vmatpush3.msra.mxu0 %v578_v62 }
 0x200   :  { %1160 = vmatprep.subr.mxu0 %v577_v1 }
 0x201   :  { %1161 = vmatpush3.msra.mxu0 %v577_v1 }
 0x202   :  { %1162 = vmatprep.subr.mxu0 %v576_v3 }
 0x203   :  { %1163 = vmatpush3.msra.mxu0 %v576_v3 }
 0x204   :  { %1164 = vmatprep.subr.mxu0 %v575_v4 }
 0x205   :  { %1165 = vmatpush3.msra.mxu0 %v575_v4  ;;  %v621_v4 = vpop.permute.xlu0 %620 }
 0x206   :  { %1166 = vmatprep.subr.mxu0 %v574_v5 }
 0x207   :  { %1167 = vmatpush3.msra.mxu0 %v574_v5 }
 0x208   :  { %1169 = vmatmul.mubr.f32.vlgmr.msra.gmra.mxu0 %v938_v10 }
 0x209   :  { %1171 = vmatprep.mubr.f32.mxu0 %v939_v7  ;;  %v617_v7 = vpop.permute.xlu1 %616 }
 0x20c   :  { %1172 = vmatmul.mubr.f32.gmra.mxu0 %v940_v8 }
 0x20d   :  { %1174 = vmatprep.mubr.f32.mxu0 %v941_v11 }
 0x210   :  { %1175 = vmatmul.mubr.f32.gmra.mxu0 %v942_v14 }
 0x211   :  { %1177 = vmatprep.mubr.f32.mxu0 %v943_v15 }
 0x214   :  { %1178 = vmatmul.mubr.f32.gmra.mxu0 %v944_v18  ;;  %v613_v18 = vpop.permute.xlu0 %612 }
 0x215   :  { %1180 = vmatprep.mubr.f32.mxu0 %v945_v19 }
 0x218   :  { %1181 = vmatmul.mubr.f32.gmra.mxu0 %v946_v22 }
 0x219   :  { %1183 = vmatprep.mubr.f32.mxu0 %v947_v23  ;;  %v609_v23 = vpop.permute.xlu1 %608 }
 0x21c   :  { %1184 = vmatmul.mubr.f32.gmra.mxu0 %v948_v26 }
 0x21d   :  { %1186 = vmatprep.mubr.f32.mxu0 %v949_v27 }
 0x220   :  { %1187 = vmatmul.mubr.f32.gmra.mxu0 %v950_v30 }
 0x221   :  { %1189 = vmatprep.mubr.f32.mxu0 %v951_v31 }
 0x224   :  { %1190 = vmatmul.mubr.f32.gmra.mxu0 %v952_v33 }
 0x2c8   :  { %v1622_v6 = vpop.f32.mrf.mxu0 }
 0x2c9   :  { %v743_v26 = vadd.f32 %v1622_v6, %v613_v18  ;;  %v832_v6 = vld [vmem:[%s1662_s4] sm:$0x1] }
 0x2ca   :  { %v1624_v9 = vpop.f32.mrf.mxu0 }
 0x2cb   :  { %v738_v30 = vadd.f32 %v1624_v9, %v609_v23  ;;  %v817_v33 = vmax.f32 %v743_v26, 0.0  ;;  %v834_v9 = vstv %s1663_s5 }
 0x2cc   :  { %v1626_v12 = vpop.f32.mrf.mxu0 }
 0x2cd   :  { %v753_v14 = vadd.f32 %v1626_v12, %v621_v4  ;;  %v816_v12 = vmax.f32 %v738_v30, 0.0 }
 0x2ce   :  { %v1628_v16 = vpop.f32.mrf.mxu0 }
 0x2cf   :  { %v748_v19 = vadd.f32 %v1628_v16, %v617_v7  ;;  %v819_v27 = vmax.f32 %v753_v14, 0.0 }
 0x2d0   :  { %v1176_v17 = vpop.f32.mrf.mxu0 }
 0x2d1   :  { %v763_v5 = vadd.f32 %v1176_v17, %v629_v60  ;;  %v818_v31 = vmax.f32 %v748_v19, 0.0 }
 0x2d2   :  { %v757_v20 = vpop.f32.mrf.mxu0 }
 0x2d3   :  { %v758_v8 = vadd.f32 %v757_v20, %v625_v63  ;;  %v821_v15 = vmax.f32 %v763_v5, 0.0 }
 0x2d4   :  { %v1179_v24 = vpop.f32.mrf.mxu0 }
 0x2d5   :  { %v773_v0 = vadd.f32 %v1179_v24, %v637_v55  ;;  %v820_v22 = vmax.f32 %v758_v8, 0.0 }
 0x2d6   :  { %v767_v25 = vpop.f32.mrf.mxu0 }
 0x2d7   :  { %v768_v2 = vadd.f32 %v767_v25, %v633_v38  ;;  %v823_v10 = vmax.f32 %v773_v0, 0.0 }
 0x2d8   :  { %v1182_v29 = vpop.f32.mrf.mxu0 }
 0x2d9   :  { %v783_v58 = vadd.f32 %v1182_v29, %v645_v45  ;;  %v822_v11 = vmax.f32 %v768_v2, 0.0 }
 0x2da   :  { %v777_v35 = vpop.f32.mrf.mxu0 }
 0x2db   :  { %v778_v61 = vadd.f32 %v777_v35, %v641_v51  ;;  %v825_v1 = vmax.f32 %v783_v58, 0.0 }
 0x2dc   :  { %v1185_v36 = vpop.f32.mrf.mxu0 }
 0x2dd   :  { %v793_v40 = vadd.f32 %v1185_v36, %v653_v42  ;;  %v824_v3 = vmax.f32 %v778_v61, 0.0 }
 0x2de   :  { %v787_v44 = vpop.f32.mrf.mxu0 }
 0x2df   :  { %v788_v56 = vadd.f32 %v787_v44, %v649_v47  ;;  %v827_v59 = vmax.f32 %v793_v40, 0.0 }
 0x2e0   :  { %v1188_v48 = vpop.f32.mrf.mxu0 }
 0x2e1   :  { %v803_v41 = vadd.f32 %v1188_v48, %v661_v21  ;;  %v826_v62 = vmax.f32 %v788_v56, 0.0 }
 0x2e2   :  { %v797_v49 = vpop.f32.mrf.mxu0 }
 0x2e3   :  { %v798_v54 = vadd.f32 %v797_v49, %v657_v32  ;;  %v829_v37 = vmax.f32 %v803_v41, 0.0 }
 0x2e4   :  { %v1191_v50 = vpop.f32.mrf.mxu0 }
 0x2e5   :  { %v813_v46 = vadd.f32 %v1191_v50, %v669_v13  ;;  %v828_v57 = vmax.f32 %v798_v54, 0.0 }
 0x2e6   :  { %v807_v52 = vpop.f32.mrf.mxu0 }
 0x2e7   :  { %v831_v53 = vmax.f32 %v813_v46, 0.0  ;;  %v808_v43 = vadd.f32 %v807_v52, %v665_v28 }
 0x2e9   :  { %v830_v39 = vmax.f32 %v808_v43, 0.0  ;;  %1193 = vmatpush3.msra.mxu1 %v831_v53 }
 0x2ea   :  { %1194 = vmatprep.subr.mxu1 %v1264_v34 }
 0x2eb   :  { %1195 = vmatpush3.msra.mxu1 %v830_v39 }
 0x2ec   :  { %1196 = vmatprep.subr.mxu1 %v1264_v34 }
 0x2ed   :  { %1197 = vmatpush3.msra.mxu1 %v829_v37 }
 0x2ee   :  { %1198 = vmatprep.subr.mxu1 %v1264_v34 }
 0x2ef   :  { %1199 = vmatpush3.msra.mxu1 %v828_v57 }
 0x2f0   :  { %1200 = vmatprep.subr.mxu1 %v1264_v34 }
 0x2f1   :  { %1201 = vmatpush3.msra.mxu1 %v827_v59 }
 0x2f2   :  { %1202 = vmatprep.subr.mxu1 %v1264_v34 }
 0x2f3   :  { %1203 = vmatpush3.msra.mxu1 %v826_v62 }
 0x2f4   :  { %1204 = vmatprep.subr.mxu1 %v1264_v34 }
 0x2f5   :  { %1205 = vmatpush3.msra.mxu1 %v825_v1 }
 0x2f6   :  { %1206 = vmatprep.subr.mxu1 %v1264_v34 }
 0x2f7   :  { %1207 = vmatpush3.msra.mxu1 %v824_v3 }
 0x2f8   :  { %1208 = vmatprep.subr.mxu1 %v1264_v34 }
 0x2f9   :  { %1209 = vmatpush3.msra.mxu1 %v823_v10 }
 0x2fa   :  { %1210 = vmatprep.subr.mxu1 %v1264_v34 }
 0x2fb   :  { %1211 = vmatpush3.msra.mxu1 %v822_v11 }
 0x2fc   :  { %1212 = vmatprep.subr.mxu1 %v1264_v34 }
 0x2fd   :  { %1213 = vmatpush3.msra.mxu1 %v821_v15 }
 0x2fe   :  { %1214 = vmatprep.subr.mxu1 %v1264_v34 }
 0x2ff   :  { %1215 = vmatpush3.msra.mxu1 %v820_v22 }
 0x300   :  { %1216 = vmatprep.subr.mxu1 %v1264_v34 }
 0x301   :  { %1217 = vmatpush3.msra.mxu1 %v819_v27 }
 0x302   :  { %1218 = vmatprep.subr.mxu1 %v1264_v34 }
 0x303   :  { %1219 = vmatpush3.msra.mxu1 %v818_v31 }
 0x304   :  { %1220 = vmatprep.subr.mxu1 %v1264_v34 }
 0x305   :  { %1221 = vmatpush3.msra.mxu1 %v817_v33 }
 0x306   :  { %1222 = vmatprep.subr.mxu1 %v1264_v34 }
 0x307   :  { %1223 = vmatpush3.msra.mxu1 %v816_v12 }
 0x308   :  { %1225 = vmatmul.mubr.f32.vlgmr.msra.gmra.mxu1 %v832_v6 }
 0x3c8   :  { %v901_v13 = vpop.f32.mrf.mxu1 }
 0x3c9   :  { %v902_v16 = vadd.f32 %v901_v13, %v834_v9 }
 0x3ca   :  { %v1226_v17 = vpop.f32.mrf.mxu1 }
 0x3cb   :  { %906 = vst.msk [vmem:[#allocation3] sm:$0x1] %vm905_vm2, %v902_v16 }
 0x3cc   :  { %1250 = shalt.err (!%p1247_p4)
}
 0x3cd   :  { %916 = dma.vmem_to_hbm [thread:$0]  %s914_s26, 16, %s1664_s6, [#allocation4]  }
 0x3ce   :  { %1259 = dma.done.wait [#allocation4], 16  }
 0x3cf   :  { %1260 = vsyncadd [#allocation4], 4294967280 }
 0x3d0   :  { %920 = vsyncpa [#allocation4], 1 }

</bundles_post_ra>
